<compile_context>
chip_gen: v7x
topology: tpu7x:2x2x1
jax: 0.10.0
libtpu: 0.0.40
codegen_flags: <defaults>
</compile_context>

<pallas_src>
import functools

import jax
import jax.numpy as jnp
from jax.experimental import pallas as pl
from jax.experimental.pallas import tpu as pltpu


def _round_up(x, k):
    return ((x + k - 1) // k) * k


def _classic_matmul_kernel(x_ref, wblk_ref, w2t_ref, out_ref, *, r_pad):
    # x:    [TB, F]      (F = n*m + m*p, unsplit)
    # wblk: [F, 2*Rp]    block-diag(W11.T, W12.T), zero-padded
    # w2t:  [Rp, Np]     W2.T, zero-padded
    # out:  [TB, Np]
    x12 = jnp.dot(x_ref[...], wblk_ref[...], preferred_element_type=jnp.float32)
    x1 = x12[:, :r_pad]          # lane-aligned slices (Rp is a multiple of 128)
    x2 = x12[:, r_pad:]
    z = (x1 * x2).astype(w2t_ref.dtype)
    out_ref[...] = jnp.dot(
        z, w2t_ref[...], preferred_element_type=jnp.float32
    ).astype(out_ref.dtype)


def prepare_params(w11, w12, w2, compute_dtype=jnp.float32, lane=128):
    """One-time parameter prep: fuse + transpose + zero-pad the weights."""
    r, nm = w11.shape
    r12, mp = w12.shape
    n_out, r2 = w2.shape
    assert r12 == r and r2 == r
    rp = _round_up(r, lane)        # padded rank (lane-dense slices / layer-2 K)
    npp = _round_up(n_out, lane)   # padded output dim (lane-dense store)
    F = nm + mp

    w_blk = jnp.zeros((F, 2 * rp), dtype=compute_dtype)
    w_blk = w_blk.at[:nm, :r].set(w11.T.astype(compute_dtype))
    w_blk = w_blk.at[nm:, rp:rp + r].set(w12.T.astype(compute_dtype))

    w2t = jnp.zeros((rp, npp), dtype=compute_dtype)
    w2t = w2t.at[:r, :n_out].set(w2.T.astype(compute_dtype))
    return w_blk, w2t, rp, n_out


def _pick_tb(B, F, npp, x_bytes, weight_bytes,
             vmem_budget=40 * 1024 * 1024, target=1024):
    """Largest lane/sublane-friendly batch tile whose double-buffered x/out
    streams (plus resident weights) fit a conservative VMEM budget."""
    per_row = 2 * (F * x_bytes + npp * 4)          # 2x: double-buffered in/out
    avail = max(vmem_budget - 2 * weight_bytes, per_row * 8)
    tb = int(min(B, target, avail // per_row))
    if tb >= B:
        return B                                    # whole batch in one step
    if tb >= 128:
        return (tb // 128) * 128
    return max(8, (tb // 8) * 8)


def _build_call(B, TB, F, rp, npp, buffered_weights):
    if buffered_weights:
        # Constant-index weights: single buffer halves their VMEM footprint.
        w_spec = lambda shape: pl.BlockSpec(shape, lambda i: (0, 0),
                                            pipeline_mode=pl.Buffered(1))
    else:
        w_spec = lambda shape: pl.BlockSpec(shape, lambda i: (0, 0))

    kernel = functools.partial(_classic_matmul_kernel, r_pad=rp)
    return pl.pallas_call(
        kernel,
        out_shape=jax.ShapeDtypeStruct((B, npp), jnp.float32),
        grid_spec=pltpu.PrefetchScalarGridSpec(
            num_scalar_prefetch=0,
            grid=(pl.cdiv(B, TB),),
            in_specs=[
                pl.BlockSpec((TB, F), lambda i: (i, 0)),   # x, batch-tiled
                w_spec((F, 2 * rp)),                       # fused layer-1 weight
                w_spec((rp, npp)),                         # layer-2 weight
            ],
            out_specs=pl.BlockSpec((TB, npp), lambda i: (i, 0)),
        ),
        compiler_params=pltpu.CompilerParams(
            dimension_semantics=("parallel",),   # megacore: shard batch over TCs
            vmem_limit_bytes=64 * 1024 * 1024,
        ),
    )


def classic_matmul_forward(x, w_blk, w2t, rp, n_out, tb=None):
    """x: [B, n*m + m*p]; (w_blk, w2t, rp, n_out) come from prepare_params."""
    B, F = x.shape
    assert w_blk.shape[0] == F
    npp = w2t.shape[1]
    compute_dtype = w_blk.dtype
    x = x.astype(compute_dtype)          # bf16 halves HBM/VMEM bytes on v6e/v7x

    itemsize = jnp.dtype(compute_dtype).itemsize
    weight_bytes = (w_blk.size + w2t.size) * itemsize
    TB = tb if tb is not None else _pick_tb(B, F, npp, itemsize, weight_bytes)

    out = None
    for buffered in (True, False):
        try:
            out = _build_call(B, TB, F, rp, npp, buffered)(x, w_blk, w2t)
            break
        except Exception:
            if not buffered:
                raise
    if npp != n_out:
        out = out[:, :n_out]
    return out


if __name__ == "__main__":
    # Module hyper-parameters (same nn.Linear shapes as the torch module).
    n, m, p, r = 2, 4, 2, 8
    B = 8

    key = jax.random.PRNGKey(0)
    kx, k11, k12, k2, kxl = jax.random.split(key, 5)

    x = jax.random.normal(kx, (B, n * m + m * p), dtype=jnp.float32)
    w11 = jax.random.normal(k11, (r, n * m), dtype=jnp.float32) * 0.1  # layer11.weight
    w12 = jax.random.normal(k12, (r, m * p), dtype=jnp.float32) * 0.1  # layer12.weight
    w2 = jax.random.normal(k2, (n * p, r), dtype=jnp.float32) * 0.1    # layer2.weight

    # Pure-JAX reference.
    def ref_fwd(xx):
        x1 = xx[:, : n * m] @ w11.T
        x2 = xx[:, n * m :] @ w12.T
        return (x1 * x2) @ w2.T

    # --- f32 path, tiny batch (matches the original test) ---
    params_f32 = prepare_params(w11, w12, w2, compute_dtype=jnp.float32)
    out_f32 = jax.block_until_ready(classic_matmul_forward(x, *params_f32))
    assert out_f32.shape == (B, n * p)
    assert jnp.allclose(out_f32, ref_fwd(x), atol=1e-4, rtol=1e-4)

    # --- bf16 path, larger batch, multi-step parallel grid (TB=128 -> 4 steps) ---
    B2 = 512
    x_big = jax.random.normal(kxl, (B2, n * m + m * p), dtype=jnp.float32)
    params_bf16 = prepare_params(w11, w12, w2, compute_dtype=jnp.bfloat16)
    out_bf16 = jax.block_until_ready(
        classic_matmul_forward(x_big, *params_bf16, tb=128))
    assert out_bf16.shape == (B2, n * p)
    assert jnp.allclose(out_bf16, ref_fwd(x_big), atol=3e-2, rtol=1e-1)

    print("KERNEL_OK")
</pallas_src>

<mosaic_0001>
module attributes {stable_mosaic.version = 11 : i64} {
  func.func @_classic_matmul_kernel(%arg0: i32, %arg1: memref<8x16xf32, #tpu.memory_space<vmem>>, %arg2: memref<16x256xf32, #tpu.memory_space<vmem>>, %arg3: memref<128x128xf32, #tpu.memory_space<vmem>>, %arg4: memref<8x128xf32, #tpu.memory_space<vmem>>) attributes {dimension_semantics = [#tpu.dimension_semantics<parallel>], iteration_bounds = array<i64: 1>, scalar_prefetch = 0 : i64, scratch_operands = 0 : i64, tpu.core_type = #tpu.core_type<tc>, window_params = [{transform_indices = @transform_0, window_bounds = array<i64: 8, 16>}, {pipeline_mode = #tpu.pipeline_mode<synchronous>, transform_indices = @transform_1, window_bounds = array<i64: 16, 256>}, {pipeline_mode = #tpu.pipeline_mode<synchronous>, transform_indices = @transform_2, window_bounds = array<i64: 128, 128>}, {transform_indices = @transform_3, window_bounds = array<i64: 8, 128>}]} {
    %c0 = arith.constant 0 : index
    %c0_0 = arith.constant 0 : index
    %0 = vector.load %arg1[%c0, %c0_0] : memref<8x16xf32, #tpu.memory_space<vmem>>, vector<8x16xf32>
    %c0_1 = arith.constant 0 : index
    %c0_2 = arith.constant 0 : index
    %1 = vector.load %arg2[%c0_1, %c0_2] : memref<16x256xf32, #tpu.memory_space<vmem>>, vector<16x256xf32>
    %cst = arith.constant dense<0.000000e+00> : vector<8x256xf32>
    %2 = tpu.matmul %0, %1, %cst {dimension_numbers = #tpu.dot_dimension_numbers<[1], [0], [0], [1], [0, 0, 1, 1], [], []>} : vector<8x16xf32>, vector<16x256xf32>, vector<8x256xf32> -> vector<8x256xf32>
    %3 = vector.extract_strided_slice %2 {offsets = [0, 0], sizes = [8, 128], strides = [1, 1]} : vector<8x256xf32> to vector<8x128xf32>
    %4 = vector.extract_strided_slice %2 {offsets = [0, 128], sizes = [8, 128], strides = [1, 1]} : vector<8x256xf32> to vector<8x128xf32>
    %5 = arith.mulf %3, %4 : vector<8x128xf32>
    %c0_3 = arith.constant 0 : index
    %c0_4 = arith.constant 0 : index
    %6 = vector.load %arg3[%c0_3, %c0_4] : memref<128x128xf32, #tpu.memory_space<vmem>>, vector<128x128xf32>
    %cst_5 = arith.constant dense<0.000000e+00> : vector<8x128xf32>
    %7 = tpu.matmul %5, %6, %cst_5 {dimension_numbers = #tpu.dot_dimension_numbers<[1], [0], [0], [1], [0, 0, 1, 1], [], []>} : vector<8x128xf32>, vector<128x128xf32>, vector<8x128xf32> -> vector<8x128xf32>
    %c0_6 = arith.constant 0 : index
    %c0_7 = arith.constant 0 : index
    %8 = vector.load %arg4[%c0_6, %c0_7] : memref<8x128xf32, #tpu.memory_space<vmem>>, vector<8x128xf32>
    tpu.vector_store %arg4[%c0_6, %c0_7], %7 {strides = array<i32>} : memref<8x128xf32, #tpu.memory_space<vmem>>, vector<8x128xf32>,
    return
  }
  func.func @transform_0(%arg0: i32) -> (i32, i32) {
    %c0_i32 = arith.constant 0 : i32
    %c0_i32_0 = arith.constant 0 : i32
    return %arg0, %c0_i32 : i32, i32
  }
  func.func @transform_1(%arg0: i32) -> (i32, i32) {
    %c0_i32 = arith.constant 0 : i32
    %c0_i32_0 = arith.constant 0 : i32
    %c0_i32_1 = arith.constant 0 : i32
    return %c0_i32, %c0_i32_0 : i32, i32
  }
  func.func @transform_2(%arg0: i32) -> (i32, i32) {
    %c0_i32 = arith.constant 0 : i32
    %c0_i32_0 = arith.constant 0 : i32
    %c0_i32_1 = arith.constant 0 : i32
    return %c0_i32, %c0_i32_0 : i32, i32
  }
  func.func @transform_3(%arg0: i32) -> (i32, i32) {
    %c0_i32 = arith.constant 0 : i32
    %c0_i32_0 = arith.constant 0 : i32
    return %arg0, %c0_i32 : i32, i32
  }
}

module attributes {stable_mosaic.version = 11 : i64} {
  func.func @_classic_matmul_kernel(%arg0: i32, %arg1: memref<8x16xf32, #tpu.memory_space<vmem>>, %arg2: memref<16x256xf32, #tpu.memory_space<vmem>>, %arg3: memref<128x128xf32, #tpu.memory_space<vmem>>, %arg4: memref<8x128xf32, #tpu.memory_space<vmem>>) attributes {dimension_semantics = [#tpu.dimension_semantics<parallel>], iteration_bounds = array<i64: 1>, scalar_prefetch = 0 : i64, scratch_operands = 0 : i64, tpu.core_type = #tpu.core_type<tc>, window_params = [{transform_indices = @transform_0, window_bounds = array<i64: 8, 16>}, {pipeline_mode = #tpu.pipeline_mode<synchronous>, transform_indices = @transform_1, window_bounds = array<i64: 16, 256>}, {pipeline_mode = #tpu.pipeline_mode<synchronous>, transform_indices = @transform_2, window_bounds = array<i64: 128, 128>}, {transform_indices = @transform_3, window_bounds = array<i64: 8, 128>}]} {
    %c0 = arith.constant 0 : index
    %c0_0 = arith.constant 0 : index
    %0 = vector.load %arg1[%c0, %c0_0] : memref<8x16xf32, #tpu.memory_space<vmem>>, vector<8x16xf32>
    %c0_1 = arith.constant 0 : index
    %c0_2 = arith.constant 0 : index
    %1 = vector.load %arg2[%c0_1, %c0_2] : memref<16x256xf32, #tpu.memory_space<vmem>>, vector<16x256xf32>
    %cst = arith.constant dense<0.000000e+00> : vector<8x256xf32>
    %2 = tpu.matmul %0, %1, %cst {dimension_numbers = #tpu.dot_dimension_numbers<[1], [0], [0], [1], [0, 0, 1, 1], [], []>} : vector<8x16xf32>, vector<16x256xf32>, vector<8x256xf32> -> vector<8x256xf32>
    %3 = vector.extract_strided_slice %2 {offsets = [0, 0], sizes = [8, 128], strides = [1, 1]} : vector<8x256xf32> to vector<8x128xf32>
    %4 = vector.extract_strided_slice %2 {offsets = [0, 128], sizes = [8, 128], strides = [1, 1]} : vector<8x256xf32> to vector<8x128xf32>
    %5 = arith.mulf %3, %4 : vector<8x128xf32>
    %c0_3 = arith.constant 0 : index
    %c0_4 = arith.constant 0 : index
    %6 = vector.load %arg3[%c0_3, %c0_4] : memref<128x128xf32, #tpu.memory_space<vmem>>, vector<128x128xf32>
    %cst_5 = arith.constant dense<0.000000e+00> : vector<8x128xf32>
    %7 = tpu.matmul %5, %6, %cst_5 {dimension_numbers = #tpu.dot_dimension_numbers<[1], [0], [0], [1], [0, 0, 1, 1], [], []>} : vector<8x128xf32>, vector<128x128xf32>, vector<8x128xf32> -> vector<8x128xf32>
    %c0_6 = arith.constant 0 : index
    %c0_7 = arith.constant 0 : index
    %8 = vector.load %arg4[%c0_6, %c0_7] : memref<8x128xf32, #tpu.memory_space<vmem>>, vector<8x128xf32>
    tpu.vector_store %arg4[%c0_6, %c0_7], %7 {strides = array<i32>} : memref<8x128xf32, #tpu.memory_space<vmem>>, vector<8x128xf32>,
    return
  }
  func.func @transform_0(%arg0: i32) -> (i32, i32) {
    %c0_i32 = arith.constant 0 : i32
    %c0_i32_0 = arith.constant 0 : i32
    return %arg0, %c0_i32 : i32, i32
  }
  func.func @transform_1(%arg0: i32) -> (i32, i32) {
    %c0_i32 = arith.constant 0 : i32
    %c0_i32_0 = arith.constant 0 : i32
    %c0_i32_1 = arith.constant 0 : i32
    return %c0_i32, %c0_i32_0 : i32, i32
  }
  func.func @transform_2(%arg0: i32) -> (i32, i32) {
    %c0_i32 = arith.constant 0 : i32
    %c0_i32_0 = arith.constant 0 : i32
    %c0_i32_1 = arith.constant 0 : i32
    return %c0_i32, %c0_i32_0 : i32, i32
  }
  func.func @transform_3(%arg0: i32) -> (i32, i32) {
    %c0_i32 = arith.constant 0 : i32
    %c0_i32_0 = arith.constant 0 : i32
    return %arg0, %c0_i32 : i32, i32
  }
}

</mosaic_0001>

<bundles_post_ra>
// kernel: tpu_custom_call.1
= control target key start
LH: loop header
LB: loop body
LE: loop exit
PB: predicated region body
PF: predicated region fallthrough
CT: control target
= control target key end

     0   :  { %8 = vsyncpa [#allocation3], 0  ;;  %s503_s0 = inlined_call_operand.hbm [shape: f32[8,16], index: 0, kind: input, shape index: {}]   ;;  %s504_s1 = inlined_call_operand.hbm [shape: f32[16,256], index: 1, kind: input, shape index: {}]   ;;  %s505_s2 = inlined_call_operand.hbm [shape: f32[128,128], index: 2, kind: input, shape index: {}]   ;;  %s506_s3 = inlined_call_operand.hbm [shape: f32[8,128], index: 3, kind: output, shape index: {}]  }
   0x1   :  { %9 = vsyncpa [#allocation6], 0 }
   0x2   :  { %10 = vsyncpa [#allocation4], 0  ;;  %s424_s12 = smov [#allocation5]   ;;  %s330_s16 = scalar_lea.hbm %s504_s1, 512 }
   0x3   :  { %s26_s13 = sshll.u32 %s424_s12, 4  ;;  %p331_p0 = scmp.ne.s32.totalorder %s504_s1, %s330_s16  ;;  %s27_s13 = int_to_ptr.vmem [resolvable:$true] %s26_s13 }
   0x4   :  { %p334_p1 = scmp.lt.u32.totalorder %s330_s16, %s504_s1 }
   0x6   :  { %p336_p2 = pnand %p334_p1, %p331_p0 }
   0x8   :  { %339 = shalt.err (!%p336_p2)
}
   0x9   :  { %s340_s21 = scalar_lea.vmem %s27_s13, 512  ;;  %p345_p4 = scmp.lt.s32.totalorder %s27_s13, %s27_s13 }
   0xa   :  { %p341_p3 = scmp.ne.s32.totalorder %s27_s13, %s340_s21  ;;  %p346_p5 = scmp.lt.s32.totalorder %s340_s21, %s340_s21 }
   0xc   :  { %p347_p6 = por %p346_p5, %p345_p4 }
   0xe   :  { %p348_p7 = pnand %p347_p6, %p341_p3 }
  0x10   :  { %351 = shalt.err (!%p348_p7)
}
  0x11   :  { %s425_s22 = smov 256   ;;  %s426_s23 = smov 16  }
  0x12   :  { %32 = dma.hbm_to_vmem [thread:$0]  %s504_s1, 512, %s27_s13, [#allocation6], %s425_s22, %s425_s22, %s426_s23  }
  0x13   :  { %s427_s26 = smov [#allocation2]   ;;  %s428_s28 = smov [#allocation7]  }
  0x14   :  { %s17_s27 = sshll.u32 %s427_s26, 4  ;;  %s38_s29 = sshll.u32 %s428_s28, 4  ;;  %s18_s27 = int_to_ptr.vmem [resolvable:$true] %s17_s27  ;;  %s39_s29 = int_to_ptr.vmem [resolvable:$true] %s38_s29 }
  0x15   :  { %s352_s5 = scalar_lea.hbm %s503_s0, 128 }
  0x16   :  { %p353_p8 = scmp.ne.s32.totalorder %s503_s0, %s352_s5  ;;  %p356_p9 = scmp.lt.u32.totalorder %s352_s5, %s503_s0 }
  0x18   :  { %p358_p10 = pnand %p356_p9, %p353_p8 }
  0x1a   :  { %361 = shalt.err (!%p358_p10)
}
  0x1b   :  { %s362_s1 = scalar_lea.vmem %s18_s27, 128  ;;  %p367_p12 = scmp.lt.s32.totalorder %s18_s27, %s18_s27 }
  0x1c   :  { %p363_p11 = scmp.ne.s32.totalorder %s18_s27, %s362_s1  ;;  %p368_p13 = scmp.lt.s32.totalorder %s362_s1, %s362_s1 }
  0x1e   :  { %p369_p0 = por %p368_p13, %p367_p12 }
  0x20   :  { %p370_p1 = pnand %p369_p0, %p363_p11 }
  0x22   :  { %373 = shalt.err (!%p370_p1)
}
  0x23   :  { %20 = dma.hbm_to_vmem [thread:$0]  %s503_s0, 128, %s18_s27, [#allocation3]  }
  0x24   :  { %s374_s14 = scalar_lea.hbm %s505_s2, 2048 }
  0x25   :  { %p375_p2 = scmp.ne.s32.totalorder %s505_s2, %s374_s14  ;;  %p378_p3 = scmp.lt.u32.totalorder %s374_s14, %s505_s2 }
  0x27   :  { %p380_p4 = pnand %p378_p3, %p375_p2 }
  0x29   :  { %383 = shalt.err (!%p380_p4)
}
  0x2a   :  { %s384_s19 = scalar_lea.vmem %s39_s29, 2048  ;;  %p389_p6 = scmp.lt.s32.totalorder %s39_s29, %s39_s29 }
  0x2b   :  { %p385_p5 = scmp.ne.s32.totalorder %s39_s29, %s384_s19  ;;  %p390_p7 = scmp.lt.s32.totalorder %s384_s19, %s384_s19 }
  0x2d   :  { %p391_p8 = por %p390_p7, %p389_p6 }
  0x2f   :  { %p392_p9 = pnand %p391_p8, %p385_p5 }
  0x31   :  { %395 = shalt.err (!%p392_p9)
}
  0x32   :  { %s429_s0 = smov 128   ;;  %s430_s20 = smov 8  }
  0x33   :  { %44 = dma.hbm_to_vmem [thread:$0]  %s505_s2, 2048, %s39_s29, [#allocation6], %s429_s0, %s429_s0, %s430_s20  }
  0x34   :  { %418 = dma.done.wait [#allocation3], 128  }
  0x35   :  { %419 = vsyncadd [#allocation3], 4294967168 }
  0x36   :  { %420 = dma.done.wait [#allocation6], 2560  }
  0x37   :  { %421 = vsyncadd [#allocation6], 4294964736  ;;  %v431_v0 = vmov 0.0   ;;  %v432_v1 = vmov 0.0|0.0   ;;  %v56_v2 = vld [vmem:[#allocation5 + $0x8] sm:$0xff]  ;;  %v58_v3 = vld [vmem:[#allocation5 + $0x18] sm:$0xff] }
  0x38   :  { %127 = vmatprep.mubr.f32.mxu0 %v431_v0  ;;  %295 = vmatprep.subr.bf16.mxu1 %v432_v1  ;;  %v55_v4 = vld [vmem:[#allocation5] sm:$0xff]  ;;  %v291_v5 = vpack.c.bf16 %v58_v3, %v56_v2  ;;  %v57_v6 = vld [vmem:[#allocation5 + $0x10] sm:$0xff]  ;;  %v136_v9 = vld [vmem:[#allocation7 + $0x8] sm:$0xff]  ;;  %vm59_vm0 = vcmask 130048   ;;  %vm433_vm1 = vmmov 0   ;;  %s434_s2 = smov [#allocation8]  }
  0x39   :  { %v135_v7 = vld [vmem:[#allocation7] sm:$0xff]  ;;  %v293_v8 = vpack.c.bf16 %v57_v6, %v55_v4  ;;  %v137_v10 = vld [vmem:[#allocation7 + $0x10] sm:$0xff]  ;;  %v138_v11 = vld [vmem:[#allocation7 + $0x18] sm:$0xff]  ;;  %288 = vmatprep.mubr.msk.f32.mxu1 %vm433_vm1, %v431_v0  ;;  %s228_s23 = sshll.u32 %s434_s2, 4  ;;  %s229_s23 = int_to_ptr.vmem [resolvable:$true] %s228_s23 }
  0x3a   :  { %292 = vmatprep.subr.bf16.mxu0 %v291_v5  ;;  %v296_v12 = vpack.c.bf16 %v136_v9, %v135_v7  ;;  %v54_v13 = vld [vmem:[#allocation2] sm:$0xff]  ;;  %v299_v14 = vpack.c.bf16 %v138_v11, %v137_v10  ;;  %v139_v15 = vld [vmem:[#allocation7 + $0x20] sm:$0xff]  ;;  %v140_v16 = vld [vmem:[#allocation7 + $0x28] sm:$0xff]  ;;  %s396_s24 = scalar_lea.vmem %s229_s23, 128  ;;  %p401_p11 = scmp.lt.s32.totalorder %s229_s23, %s229_s23 }
  0x3b   :  { %294 = vmatpush1.bf16.msra.mxu0 %v293_v8  ;;  %v302_v17 = vpack.c.bf16 %v140_v16, %v139_v15  ;;  %v141_v18 = vld [vmem:[#allocation7 + $0x30] sm:$0xff]  ;;  %v142_v19 = vld [vmem:[#allocation7 + $0x38] sm:$0xff]  ;;  %v143_v21 = vld [vmem:[#allocation7 + $0x40] sm:$0xff]  ;;  %p397_p10 = scmp.ne.s32.totalorder %s229_s23, %s396_s24  ;;  %p402_p12 = scmp.lt.s32.totalorder %s396_s24, %s396_s24 }
  0x3c   :  { %297 = vmatpush3.bf16.msra.mxu1 %v296_v12  ;;  %v305_v20 = vpack.c.bf16 %v142_v19, %v141_v18  ;;  %v144_v22 = vld [vmem:[#allocation7 + $0x48] sm:$0xff]  ;;  %v145_v24 = vld [vmem:[#allocation7 + $0x50] sm:$0xff]  ;;  %v146_v25 = vld [vmem:[#allocation7 + $0x58] sm:$0xff] }
  0x3d   :  { %298 = vmatprep.subr.bf16.mxu1 %v432_v1  ;;  %v308_v23 = vpack.c.bf16 %v144_v22, %v143_v21  ;;  %v311_v26 = vpack.c.bf16 %v146_v25, %v145_v24  ;;  %v147_v27 = vld [vmem:[#allocation7 + $0x60] sm:$0xff]  ;;  %v148_v28 = vld [vmem:[#allocation7 + $0x68] sm:$0xff]  ;;  %v149_v30 = vld [vmem:[#allocation7 + $0x70] sm:$0xff]  ;;  %p403_p13 = por %p402_p12, %p401_p11 }
  0x3e   :  { %238 = vmatmul.mubr.msk.f32.vlgmr.msra.gmra.mrb[0].mxu0 %vm59_vm0, %v54_v13  ;;  %v314_v29 = vpack.c.bf16 %v148_v28, %v147_v27  ;;  %v150_v31 = vld [vmem:[#allocation7 + $0x78] sm:$0xff] }
  0x3f   :  { %v317_v32 = vpack.c.bf16 %v150_v31, %v149_v30  ;;  %p404_p0 = pnand %p403_p13, %p397_p10 }
  0x40   :  { %300 = vmatpush3.bf16.msra.mxu1 %v299_v14 }
  0x41   :  { %301 = vmatprep.subr.bf16.mxu1 %v432_v1 }
  0x44   :  { %303 = vmatpush3.bf16.msra.mxu1 %v302_v17 }
  0x45   :  { %304 = vmatprep.subr.bf16.mxu1 %v432_v1 }
  0x48   :  { %306 = vmatpush3.bf16.msra.mxu1 %v305_v20 }
  0x49   :  { %307 = vmatprep.subr.bf16.mxu1 %v432_v1 }
  0x4c   :  { %309 = vmatpush3.bf16.msra.mxu1 %v308_v23 }
  0x4d   :  { %310 = vmatprep.subr.bf16.mxu1 %v432_v1 }
  0x50   :  { %312 = vmatpush3.bf16.msra.mxu1 %v311_v26 }
  0x51   :  { %313 = vmatprep.subr.bf16.mxu1 %v432_v1 }
  0x54   :  { %315 = vmatpush3.bf16.msra.mxu1 %v314_v29 }
  0x55   :  { %316 = vmatprep.subr.bf16.mxu1 %v432_v1 }
  0x58   :  { %318 = vmatpush3.bf16.msra.mxu1 %v317_v32 }
 0x111   :  { %v129_v33 = vpop.f32.mrb[0].mxu0 }
 0x112   :  { %v131_v34 = vpop.f32.mrb[1].mxu0 }
 0x113   :  { %v134_v35 = vmul.f32 %v131_v34, %v129_v33 }
 0x115   :  { %289 = vmatmul.mubr.f32.vlgmr.msra.gmra.mrb[0].mxu1 %v134_v35 }
 0x1e8   :  { %v217_v36 = vpop.f32.mrb[0].mxu1 }
 0x1e9   :  { %221 = vst [vmem:[#allocation8] sm:$0xff] %v217_v36  ;;  %v290_v37 = vpop.f32.mrb[1].mxu1 }
 0x1ea   :  { %407 = shalt.err (!%p404_p0)
}
 0x1eb   :  { %s408_s27 = scalar_lea.hbm %s506_s3, 128 }
 0x1ec   :  { %p409_p1 = scmp.ne.s32.totalorder %s506_s3, %s408_s27  ;;  %p412_p2 = scmp.lt.u32.totalorder %s408_s27, %s506_s3 }
 0x1ee   :  { %p414_p3 = pnand %p412_p2, %p409_p1 }
 0x1f0   :  { %417 = shalt.err (!%p414_p3)
}
 0x1f1   :  { %231 = dma.vmem_to_hbm [thread:$0]  %s229_s23, 128, %s506_s3, [#allocation4]  }
 0x1f2   :  { %422 = dma.done.wait [#allocation4], 128  }
 0x1f3   :  { %423 = vsyncadd [#allocation4], 4294967168 }
 0x1f4   :  { %235 = vsyncpa [#allocation3], 1 }
 0x1f5   :  { %236 = vsyncpa [#allocation6], 1 }
 0x1f6   :  { %237 = vsyncpa [#allocation4], 1 }

// kernel: tpu_custom_call.1
= control target key start
LH: loop header
LB: loop body
LE: loop exit
PB: predicated region body
PF: predicated region fallthrough
CT: control target
= control target key end

     0   :  { %8 = vsyncpa [#allocation3], 0  ;;  %s503_s0 = inlined_call_operand.hbm [shape: f32[8,16], index: 0, kind: input, shape index: {}]   ;;  %s504_s1 = inlined_call_operand.hbm [shape: f32[16,256], index: 1, kind: input, shape index: {}]   ;;  %s505_s2 = inlined_call_operand.hbm [shape: f32[128,128], index: 2, kind: input, shape index: {}]   ;;  %s506_s3 = inlined_call_operand.hbm [shape: f32[8,128], index: 3, kind: output, shape index: {}]  }
   0x1   :  { %9 = vsyncpa [#allocation6], 0 }
   0x2   :  { %10 = vsyncpa [#allocation4], 0  ;;  %s424_s12 = smov [#allocation5]   ;;  %s330_s16 = scalar_lea.hbm %s504_s1, 512 }
   0x3   :  { %s26_s13 = sshll.u32 %s424_s12, 4  ;;  %p331_p0 = scmp.ne.s32.totalorder %s504_s1, %s330_s16  ;;  %s27_s13 = int_to_ptr.vmem [resolvable:$true] %s26_s13 }
   0x4   :  { %p334_p1 = scmp.lt.u32.totalorder %s330_s16, %s504_s1 }
   0x6   :  { %p336_p2 = pnand %p334_p1, %p331_p0 }
   0x8   :  { %339 = shalt.err (!%p336_p2)
}
   0x9   :  { %s340_s21 = scalar_lea.vmem %s27_s13, 512  ;;  %p345_p4 = scmp.lt.s32.totalorder %s27_s13, %s27_s13 }
   0xa   :  { %p341_p3 = scmp.ne.s32.totalorder %s27_s13, %s340_s21  ;;  %p346_p5 = scmp.lt.s32.totalorder %s340_s21, %s340_s21 }
   0xc   :  { %p347_p6 = por %p346_p5, %p345_p4 }
   0xe   :  { %p348_p7 = pnand %p347_p6, %p341_p3 }
  0x10   :  { %351 = shalt.err (!%p348_p7)
}
  0x11   :  { %s425_s22 = smov 256   ;;  %s426_s23 = smov 16  }
  0x12   :  { %32 = dma.hbm_to_vmem [thread:$0]  %s504_s1, 512, %s27_s13, [#allocation6], %s425_s22, %s425_s22, %s426_s23  }
  0x13   :  { %s427_s26 = smov [#allocation2]   ;;  %s428_s28 = smov [#allocation7]  }
  0x14   :  { %s17_s27 = sshll.u32 %s427_s26, 4  ;;  %s38_s29 = sshll.u32 %s428_s28, 4  ;;  %s18_s27 = int_to_ptr.vmem [resolvable:$true] %s17_s27  ;;  %s39_s29 = int_to_ptr.vmem [resolvable:$true] %s38_s29 }
  0x15   :  { %s352_s5 = scalar_lea.hbm %s503_s0, 128 }
  0x16   :  { %p353_p8 = scmp.ne.s32.totalorder %s503_s0, %s352_s5  ;;  %p356_p9 = scmp.lt.u32.totalorder %s352_s5, %s503_s0 }
  0x18   :  { %p358_p10 = pnand %p356_p9, %p353_p8 }
  0x1a   :  { %361 = shalt.err (!%p358_p10)
}
  0x1b   :  { %s362_s1 = scalar_lea.vmem %s18_s27, 128  ;;  %p367_p12 = scmp.lt.s32.totalorder %s18_s27, %s18_s27 }
  0x1c   :  { %p363_p11 = scmp.ne.s32.totalorder %s18_s27, %s362_s1  ;;  %p368_p13 = scmp.lt.s32.totalorder %s362_s1, %s362_s1 }
  0x1e   :  { %p369_p0 = por %p368_p13, %p367_p12 }
  0x20   :  { %p370_p1 = pnand %p369_p0, %p363_p11 }
  0x22   :  { %373 = shalt.err (!%p370_p1)
}
  0x23   :  { %20 = dma.hbm_to_vmem [thread:$0]  %s503_s0, 128, %s18_s27, [#allocation3]  }
  0x24   :  { %s374_s14 = scalar_lea.hbm %s505_s2, 2048 }
  0x25   :  { %p375_p2 = scmp.ne.s32.totalorder %s505_s2, %s374_s14  ;;  %p378_p3 = scmp.lt.u32.totalorder %s374_s14, %s505_s2 }
  0x27   :  { %p380_p4 = pnand %p378_p3, %p375_p2 }
  0x29   :  { %383 = shalt.err (!%p380_p4)
}
  0x2a   :  { %s384_s19 = scalar_lea.vmem %s39_s29, 2048  ;;  %p389_p6 = scmp.lt.s32.totalorder %s39_s29, %s39_s29 }
  0x2b   :  { %p385_p5 = scmp.ne.s32.totalorder %s39_s29, %s384_s19  ;;  %p390_p7 = scmp.lt.s32.totalorder %s384_s19, %s384_s19 }
  0x2d   :  { %p391_p8 = por %p390_p7, %p389_p6 }
  0x2f   :  { %p392_p9 = pnand %p391_p8, %p385_p5 }
  0x31   :  { %395 = shalt.err (!%p392_p9)
}
  0x32   :  { %s429_s0 = smov 128   ;;  %s430_s20 = smov 8  }
  0x33   :  { %44 = dma.hbm_to_vmem [thread:$0]  %s505_s2, 2048, %s39_s29, [#allocation6], %s429_s0, %s429_s0, %s430_s20  }
  0x34   :  { %418 = dma.done.wait [#allocation3], 128  }
  0x35   :  { %419 = vsyncadd [#allocation3], 4294967168 }
  0x36   :  { %420 = dma.done.wait [#allocation6], 2560  }
  0x37   :  { %421 = vsyncadd [#allocation6], 4294964736  ;;  %v431_v0 = vmov 0.0   ;;  %v432_v1 = vmov 0.0|0.0   ;;  %v56_v2 = vld [vmem:[#allocation5 + $0x8] sm:$0xff]  ;;  %v58_v3 = vld [vmem:[#allocation5 + $0x18] sm:$0xff] }
  0x38   :  { %127 = vmatprep.mubr.f32.mxu0 %v431_v0  ;;  %295 = vmatprep.subr.bf16.mxu1 %v432_v1  ;;  %v55_v4 = vld [vmem:[#allocation5] sm:$0xff]  ;;  %v291_v5 = vpack.c.bf16 %v58_v3, %v56_v2  ;;  %v57_v6 = vld [vmem:[#allocation5 + $0x10] sm:$0xff]  ;;  %v136_v9 = vld [vmem:[#allocation7 + $0x8] sm:$0xff]  ;;  %vm59_vm0 = vcmask 130048   ;;  %vm433_vm1 = vmmov 0   ;;  %s434_s2 = smov [#allocation8]  }
  0x39   :  { %v135_v7 = vld [vmem:[#allocation7] sm:$0xff]  ;;  %v293_v8 = vpack.c.bf16 %v57_v6, %v55_v4  ;;  %v137_v10 = vld [vmem:[#allocation7 + $0x10] sm:$0xff]  ;;  %v138_v11 = vld [vmem:[#allocation7 + $0x18] sm:$0xff]  ;;  %288 = vmatprep.mubr.msk.f32.mxu1 %vm433_vm1, %v431_v0  ;;  %s228_s23 = sshll.u32 %s434_s2, 4  ;;  %s229_s23 = int_to_ptr.vmem [resolvable:$true] %s228_s23 }
  0x3a   :  { %292 = vmatprep.subr.bf16.mxu0 %v291_v5  ;;  %v296_v12 = vpack.c.bf16 %v136_v9, %v135_v7  ;;  %v54_v13 = vld [vmem:[#allocation2] sm:$0xff]  ;;  %v299_v14 = vpack.c.bf16 %v138_v11, %v137_v10  ;;  %v139_v15 = vld [vmem:[#allocation7 + $0x20] sm:$0xff]  ;;  %v140_v16 = vld [vmem:[#allocation7 + $0x28] sm:$0xff]  ;;  %s396_s24 = scalar_lea.vmem %s229_s23, 128  ;;  %p401_p11 = scmp.lt.s32.totalorder %s229_s23, %s229_s23 }
  0x3b   :  { %294 = vmatpush1.bf16.msra.mxu0 %v293_v8  ;;  %v302_v17 = vpack.c.bf16 %v140_v16, %v139_v15  ;;  %v141_v18 = vld [vmem:[#allocation7 + $0x30] sm:$0xff]  ;;  %v142_v19 = vld [vmem:[#allocation7 + $0x38] sm:$0xff]  ;;  %v143_v21 = vld [vmem:[#allocation7 + $0x40] sm:$0xff]  ;;  %p397_p10 = scmp.ne.s32.totalorder %s229_s23, %s396_s24  ;;  %p402_p12 = scmp.lt.s32.totalorder %s396_s24, %s396_s24 }
  0x3c   :  { %297 = vmatpush3.bf16.msra.mxu1 %v296_v12  ;;  %v305_v20 = vpack.c.bf16 %v142_v19, %v141_v18  ;;  %v144_v22 = vld [vmem:[#allocation7 + $0x48] sm:$0xff]  ;;  %v145_v24 = vld [vmem:[#allocation7 + $0x50] sm:$0xff]  ;;  %v146_v25 = vld [vmem:[#allocation7 + $0x58] sm:$0xff] }
  0x3d   :  { %298 = vmatprep.subr.bf16.mxu1 %v432_v1  ;;  %v308_v23 = vpack.c.bf16 %v144_v22, %v143_v21  ;;  %v311_v26 = vpack.c.bf16 %v146_v25, %v145_v24  ;;  %v147_v27 = vld [vmem:[#allocation7 + $0x60] sm:$0xff]  ;;  %v148_v28 = vld [vmem:[#allocation7 + $0x68] sm:$0xff]  ;;  %v149_v30 = vld [vmem:[#allocation7 + $0x70] sm:$0xff]  ;;  %p403_p13 = por %p402_p12, %p401_p11 }
  0x3e   :  { %238 = vmatmul.mubr.msk.f32.vlgmr.msra.gmra.mrb[0].mxu0 %vm59_vm0, %v54_v13  ;;  %v314_v29 = vpack.c.bf16 %v148_v28, %v147_v27  ;;  %v150_v31 = vld [vmem:[#allocation7 + $0x78] sm:$0xff] }
  0x3f   :  { %v317_v32 = vpack.c.bf16 %v150_v31, %v149_v30  ;;  %p404_p0 = pnand %p403_p13, %p397_p10 }
  0x40   :  { %300 = vmatpush3.bf16.msra.mxu1 %v299_v14 }
  0x41   :  { %301 = vmatprep.subr.bf16.mxu1 %v432_v1 }
  0x44   :  { %303 = vmatpush3.bf16.msra.mxu1 %v302_v17 }
  0x45   :  { %304 = vmatprep.subr.bf16.mxu1 %v432_v1 }
  0x48   :  { %306 = vmatpush3.bf16.msra.mxu1 %v305_v20 }
  0x49   :  { %307 = vmatprep.subr.bf16.mxu1 %v432_v1 }
  0x4c   :  { %309 = vmatpush3.bf16.msra.mxu1 %v308_v23 }
  0x4d   :  { %310 = vmatprep.subr.bf16.mxu1 %v432_v1 }
  0x50   :  { %312 = vmatpush3.bf16.msra.mxu1 %v311_v26 }
  0x51   :  { %313 = vmatprep.subr.bf16.mxu1 %v432_v1 }
  0x54   :  { %315 = vmatpush3.bf16.msra.mxu1 %v314_v29 }
  0x55   :  { %316 = vmatprep.subr.bf16.mxu1 %v432_v1 }
  0x58   :  { %318 = vmatpush3.bf16.msra.mxu1 %v317_v32 }
 0x111   :  { %v129_v33 = vpop.f32.mrb[0].mxu0 }
 0x112   :  { %v131_v34 = vpop.f32.mrb[1].mxu0 }
 0x113   :  { %v134_v35 = vmul.f32 %v131_v34, %v129_v33 }
 0x115   :  { %289 = vmatmul.mubr.f32.vlgmr.msra.gmra.mrb[0].mxu1 %v134_v35 }
 0x1e8   :  { %v217_v36 = vpop.f32.mrb[0].mxu1 }
 0x1e9   :  { %221 = vst [vmem:[#allocation8] sm:$0xff] %v217_v36  ;;  %v290_v37 = vpop.f32.mrb[1].mxu1 }
 0x1ea   :  { %407 = shalt.err (!%p404_p0)
}
 0x1eb   :  { %s408_s27 = scalar_lea.hbm %s506_s3, 128 }
 0x1ec   :  { %p409_p1 = scmp.ne.s32.totalorder %s506_s3, %s408_s27  ;;  %p412_p2 = scmp.lt.u32.totalorder %s408_s27, %s506_s3 }
 0x1ee   :  { %p414_p3 = pnand %p412_p2, %p409_p1 }
 0x1f0   :  { %417 = shalt.err (!%p414_p3)
}
 0x1f1   :  { %231 = dma.vmem_to_hbm [thread:$0]  %s229_s23, 128, %s506_s3, [#allocation4]  }
 0x1f2   :  { %422 = dma.done.wait [#allocation4], 128  }
 0x1f3   :  { %423 = vsyncadd [#allocation4], 4294967168 }
 0x1f4   :  { %235 = vsyncpa [#allocation3], 1 }
 0x1f5   :  { %236 = vsyncpa [#allocation6], 1 }
 0x1f6   :  { %237 = vsyncpa [#allocation4], 1 }

</bundles_post_ra>
